<compile_context>
chip_gen: v6e
topology: v6e:2x2x1
jax: 0.10.0
libtpu: 0.0.40
codegen_flags: <defaults>
</compile_context>

<pallas_src>
import jax
import jax.numpy as jnp
from jax import lax
from jax.experimental import pallas as pl
from jax.experimental.pallas import tpu as pltpu

INPUT_SIZE = 5
OUTPUT_SIZE = 2


def _linear_kernel(x_ref, w_ref, b_ref, o_ref):
    # y = x @ w.T + b, with w stored PyTorch-style as (OUT, IN).
    # Contract dim 1 of both operands -> transposition is handled by operand
    # routing; no separate transpose op inside or outside the kernel.
    acc = lax.dot_general(
        x_ref[...], w_ref[...],
        dimension_numbers=(((1,), (1,)), ((), ())),
        preferred_element_type=jnp.float32,
    )                                           # (B_tile, OUT) f32
    o_ref[...] = (acc + b_ref[...]).astype(o_ref.dtype)


def linear_forward(x, weight, bias, *, batch_tile=8192):
    """y = x @ weight.T + bias, matching nn.Linear semantics.

    x:      (B, IN)   float32
    weight: (OUT, IN) float32  (PyTorch convention, NOT pre-transposed)
    bias:   (OUT,)    float32
    returns (B, OUT)  float32
    """
    B, IN = x.shape
    OUT = weight.shape[0]
    b2d = bias.reshape(1, OUT)  # 2-D VMEM tile (cheap broadcast add; SMEM would pad badly)

    cost = pl.CostEstimate(
        flops=2 * B * IN * OUT,
        transcendentals=0,
        bytes_accessed=4 * (B * IN + OUT * IN + OUT + B * OUT),
    )

    if B <= batch_tile:
        # Small/medium batch: single gridless invocation, everything in VMEM.
        return pl.pallas_call(
            _linear_kernel,
            out_shape=jax.ShapeDtypeStruct((B, OUT), jnp.float32),
            in_specs=[
                pl.BlockSpec(memory_space=pltpu.MemorySpace.VMEM),
                pl.BlockSpec(memory_space=pltpu.MemorySpace.VMEM),
                pl.BlockSpec(memory_space=pltpu.MemorySpace.VMEM),
            ],
            out_specs=pl.BlockSpec(memory_space=pltpu.MemorySpace.VMEM),
            cost_estimate=cost,
        )(x, weight, b2d)

    # Large batch (data-parallel case): the op is purely HBM-bandwidth-bound
    # (~28 B/row vs ~20 flops/row), so tile only the batch dim with big
    # sublane-aligned blocks; weight/bias stay resident across the grid.
    tb = batch_tile  # multiple of 8; 8192 rows * (5+2) f32 double-buffered << 32 MiB
    return pl.pallas_call(
        _linear_kernel,
        out_shape=jax.ShapeDtypeStruct((B, OUT), jnp.float32),
        grid=(pl.cdiv(B, tb),),
        in_specs=[
            pl.BlockSpec((tb, IN), lambda i: (i, 0)),
            pl.BlockSpec((OUT, IN), lambda i: (0, 0)),
            pl.BlockSpec((1, OUT), lambda i: (0, 0)),
        ],
        out_specs=pl.BlockSpec((tb, OUT), lambda i: (i, 0)),
        compiler_params=pltpu.CompilerParams(
            # Batch rows are independent -> shard grid steps across TCs on v7x.
            dimension_semantics=("parallel",),
            vmem_limit_bytes=32 * 1024 * 1024,  # fits v7x's 64 MiB VMEM with headroom
        ),
        cost_estimate=cost,
    )(x, weight, b2d)


if __name__ == "__main__":
    key = jax.random.PRNGKey(0)
    k_x, k_w, k_b, k_x2 = jax.random.split(key, 4)

    # Deterministic parameter init, mimicking nn.Linear's U(-1/sqrt(in), 1/sqrt(in)).
    bound = 1.0 / (INPUT_SIZE ** 0.5)
    weight = jax.random.uniform(
        k_w, (OUTPUT_SIZE, INPUT_SIZE), jnp.float32, minval=-bound, maxval=bound
    )
    bias = jax.random.uniform(
        k_b, (OUTPUT_SIZE,), jnp.float32, minval=-bound, maxval=bound
    )

    # Small-batch path (matches the tutorial's tiny shapes).
    B = 8
    x = jax.random.normal(k_x, (B, INPUT_SIZE), jnp.float32)
    out = jax.block_until_ready(linear_forward(x, weight, bias))
    ref = x @ weight.T + bias
    assert out.shape == (B, OUTPUT_SIZE)
    assert jnp.allclose(out, ref, atol=1e-5, rtol=1e-5)

    # Exercise the batch-tiled (data-parallel) path once as well.
    B_big = 16384
    x_big = jax.random.normal(k_x2, (B_big, INPUT_SIZE), jnp.float32)
    out_big = jax.block_until_ready(linear_forward(x_big, weight, bias, batch_tile=4096))
    ref_big = x_big @ weight.T + bias
    assert out_big.shape == (B_big, OUTPUT_SIZE)
    assert jnp.allclose(out_big, ref_big, atol=1e-5, rtol=1e-5)

    print("KERNEL_OK")
</pallas_src>

<mosaic_0001>
module attributes {stable_mosaic.version = 11 : i64} {
  func.func @_linear_kernel(%arg0: memref<8x5xf32, #tpu.memory_space<vmem>>, %arg1: memref<2x5xf32, #tpu.memory_space<vmem>>, %arg2: memref<1x2xf32, #tpu.memory_space<vmem>>, %arg3: memref<8x2xf32, #tpu.memory_space<vmem>>) attributes {dimension_semantics = [], scalar_prefetch = 0 : i64, scratch_operands = 0 : i64, tpu.core_type = #tpu.core_type<tc>} {
    %c0 = arith.constant 0 : index
    %c0_0 = arith.constant 0 : index
    %0 = vector.load %arg0[%c0, %c0_0] : memref<8x5xf32, #tpu.memory_space<vmem>>, vector<8x5xf32>
    %c0_1 = arith.constant 0 : index
    %c0_2 = arith.constant 0 : index
    %1 = vector.load %arg1[%c0_1, %c0_2] : memref<2x5xf32, #tpu.memory_space<vmem>>, vector<2x5xf32>
    %cst = arith.constant dense<0.000000e+00> : vector<8x2xf32>
    %2 = tpu.matmul %0, %1, %cst {dimension_numbers = #tpu.dot_dimension_numbers<[1], [1], [0], [0], [0, 0, 1, 0], [], []>} : vector<8x5xf32>, vector<2x5xf32>, vector<8x2xf32> -> vector<8x2xf32>
    %c0_3 = arith.constant 0 : index
    %c0_4 = arith.constant 0 : index
    %3 = vector.load %arg2[%c0_3, %c0_4] : memref<1x2xf32, #tpu.memory_space<vmem>>, vector<1x2xf32>
    %4 = vector.broadcast %3 : vector<1x2xf32> to vector<8x2xf32>
    %5 = arith.addf %2, %4 : vector<8x2xf32>
    %c0_5 = arith.constant 0 : index
    %c0_6 = arith.constant 0 : index
    %6 = vector.load %arg3[%c0_5, %c0_6] : memref<8x2xf32, #tpu.memory_space<vmem>>, vector<8x2xf32>
    tpu.vector_store %arg3[%c0_5, %c0_6], %5 {strides = array<i32>} : memref<8x2xf32, #tpu.memory_space<vmem>>, vector<8x2xf32>,
    return
  }
}

</mosaic_0001>

<bundles_post_ra>
// kernel: tpu_custom_call.1
= control target key start
LH: loop header
LB: loop body
LE: loop exit
PB: predicated region body
PF: predicated region fallthrough
CT: control target
= control target key end

     0   :  { %8 = vsyncpa [#allocation3], 0  ;;  %s226_s0 = inlined_call_operand.hbm [shape: f32[8,5], index: 0, kind: input, shape index: {}]   ;;  %s227_s1 = inlined_call_operand.hbm [shape: f32[2,5], index: 1, kind: input, shape index: {}]   ;;  %s228_s2 = inlined_call_operand.vmem [shape: f32[1,2], index: 2, kind: input, shape index: {}]   ;;  %s229_s3 = inlined_call_operand.vmem [shape: f32[8,2], index: 3, kind: output, shape index: {}]  }
   0x1   :  { %9 = vsyncpa [#allocation5], 0  ;;  %s190_s12 = smov [#allocation2]   ;;  %s191_s14 = smov [#allocation4]  }
   0x2   :  { %s16_s13 = sshll.u32 %s190_s12, 4  ;;  %s26_s15 = sshll.u32 %s191_s14, 4  ;;  %s17_s13 = int_to_ptr.vmem [resolvable:$true] %s16_s13  ;;  %s27_s15 = int_to_ptr.vmem [resolvable:$true] %s26_s15 }
   0x3   :  { %s154_s16 = scalar_lea.vmem %s17_s13, 128  ;;  %p159_p1 = scmp.lt.s32.totalorder %s17_s13, %s17_s13 }
   0x4   :  { %p155_p0 = scmp.ne.s32.totalorder %s17_s13, %s154_s16  ;;  %p160_p2 = scmp.lt.s32.totalorder %s154_s16, %s154_s16 }
   0x6   :  { %p161_p3 = por %p160_p2, %p159_p1 }
   0x8   :  { %p162_p4 = pnand %p161_p3, %p155_p0 }
   0xa   :  { %165 = shalt.err (!%p162_p4)
}
   0xb   :  { %19 = dma.hbm_to_vmem [thread:$0]  %s226_s0, 128, %s17_s13, [#allocation3]  }
   0xc   :  { %s174_s19 = scalar_lea.vmem %s27_s15, 32  ;;  %p179_p6 = scmp.lt.s32.totalorder %s27_s15, %s27_s15 }
   0xd   :  { %p175_p5 = scmp.ne.s32.totalorder %s27_s15, %s174_s19  ;;  %p180_p7 = scmp.lt.s32.totalorder %s174_s19, %s174_s19 }
   0xf   :  { %p181_p8 = por %p180_p7, %p179_p6 }
  0x11   :  { %p182_p9 = pnand %p181_p8, %p175_p5 }
  0x13   :  { %185 = shalt.err (!%p182_p9)
}
  0x14   :  { %29 = dma.hbm_to_vmem [thread:$0]  %s227_s1, 32, %s27_s15, [#allocation5]  }
  0x15   :  { %186 = dma.done.wait [#allocation3], 128  }
  0x16   :  { %187 = vsyncadd [#allocation3], 4294967168 }
  0x17   :  { %188 = dma.done.wait [#allocation5], 32  }
  0x18   :  { %189 = vsyncadd [#allocation5], 4294967264  ;;  %v192_v0 = vmov 0.0   ;;  %vm193_vm0 = vmmov 0   ;;  %vm47_vm1 = vcmask 39936   ;;  %v38_v2 = vld [vmem:[#allocation2] sm:$0xff] }
  0x19   :  { %137 = vmatprep.subr.mxu0 %v192_v0  ;;  %139 = vmatprep.mubr.msk.f32.mxu0 %vm193_vm0, %v192_v0  ;;  %v39_v1 = vld [vmem:[#allocation4] sm:$0x3]  ;;  %v132_v3 = vld [vmem:[%s228_s2] ss:$0 sm:$0xff]  ;;  %vm124_vm2 = vcmask 15360  }
  0x1a   :  { %138 = vmatpush3.xpose.msk.msra.mxu0 %vm47_vm1, %v39_v1 }
  0x1d   :  { %140 = vmatmul.mubr.msk.f32.vlgmr.msra.gmra.mxu0 %vm47_vm1, %v38_v2 }
  0xdd   :  { %v120_v4 = vpop.f32.mrf.mxu0 }
  0xde   :  { %v121_v5 = vadd.f32 %v132_v3, %v120_v4 }
  0xdf   :  { %v141_v6 = vpop.f32.mrf.mxu0 }
  0xe0   :  { %125 = vst.msk [vmem:[%s229_s3] sm:$0xff] %vm124_vm2, %v121_v5 }
  0xe1   :  { %130 = vsyncpa [#allocation3], 1 }
  0xe2   :  { %131 = vsyncpa [#allocation5], 1 }

</bundles_post_ra>
